<compile_context>
chip_gen: v7x
topology: tpu7x:2x2x1
jax: 0.10.0
libtpu: 0.0.40
codegen_flags: <defaults>
</compile_context>

<pallas_src>
import math

import jax
import jax.numpy as jnp
from jax.experimental import pallas as pl
from jax.experimental.pallas import tpu as pltpu

_LANES = 128


def build_pe_table(max_len: int, d_model: int) -> jnp.ndarray:
    """Deterministic sinusoidal PE buffer, shape (1, max_len, d_model)."""
    position = jnp.arange(max_len, dtype=jnp.float32)[:, None]            # (L, 1)
    div_term = jnp.exp(
        jnp.arange(0, d_model, 2, dtype=jnp.float32) * (-math.log(10000.0) / d_model)
    )                                                                      # (D/2,)
    pe = jnp.zeros((max_len, d_model), dtype=jnp.float32)
    pe = pe.at[:, 0::2].set(jnp.sin(position * div_term))
    pe = pe.at[:, 1::2].set(jnp.cos(position * div_term))
    return pe[None, :, :]                                                  # (1, L, D)


def _pe_add_kernel(x_ref, pe_ref, o_ref):
    # x_ref/o_ref: (tr, L) tile in VMEM; pe_ref: (1, L) row broadcast over rows.
    o_ref[...] = x_ref[...] + pe_ref[...]


def _pick_row_tile(R: int, sub: int, max_rows: int) -> int:
    """Row tile: >=4 grid steps when possible, byte-budget capped, divides R."""
    if R <= 4 * sub:
        return R  # tiny: one full-extent block (always a legal tile)
    tr0 = max(sub, min(max_rows, (pl.cdiv(R, 4) // sub) * sub))
    # Prefer a tile that divides R exactly (no ragged/masked tail block).
    tr = tr0
    while tr > sub and R % tr != 0:
        tr -= sub
    return tr if R % tr == 0 else tr0


def position_embedding_forward(
    x: jnp.ndarray,
    pe: jnp.ndarray,
    *,
    block_bytes: int = 2 << 20,      # per-block budget; ~4x lives in VMEM
    prefer_xla_below: int = 1 << 17, # tiny tensors: let XLA fuse the add
    donate_x: bool = False,          # only alias if the caller donates x
    input_buffers: int = 2,          # >2: deeper read pipelining (v7x tuning)
) -> jnp.ndarray:
    """x: (B, S, D); pe: (1, max_len, D) buffer. Returns x + pe[:, S, :]."""
    B, S, D = x.shape
    max_len = pe.shape[1]
    if S >= max_len:
        # PyTorch would raise IndexError on pe[:, S, :]; don't silently clamp.
        raise IndexError(f"sequence length {S} >= max_len {max_len}")

    # Single PE row at index == seq_len (faithful to the original module).
    pe_row = pe[0, S, :].astype(x.dtype)                                   # (D,)

    if x.size < prefer_xla_below:
        # Tiny tensors: custom-call + DMA-setup overhead dwarfs the work;
        # let XLA fuse the broadcast add into neighboring ops instead.
        return x + pe_row[None, None, :]

    total = B * S * D
    # Lane-dense repack width: W = lcm(D, 128).  Each W-lane row then holds
    # W // D consecutive (b, s) vectors; tiling the single PE row W // D
    # times keeps the add exact while every vreg/store is fully populated.
    W = (D * _LANES) // math.gcd(D, _LANES)
    if total % W == 0:
        x2 = x.reshape(total // W, W)
        pe2 = jnp.tile(pe_row, W // D)[None, :]                            # (1, W)
    else:
        # Fallback: masked partial stores if D is not a multiple of 128.
        x2 = x.reshape(B * S, D)
        pe2 = pe_row[None, :]                                              # (1, D)

    R, L = x2.shape
    itemsize = jnp.dtype(x.dtype).itemsize

    # Sublane granularity: 8 rows for 32-bit dtypes, 16 for bf16/fp16, 32 for int8.
    sub = 8 * max(1, 4 // itemsize)
    # Byte budget -> max rows per block (>= sub).
    max_rows = max(sub, (block_bytes // (L * itemsize)) // sub * sub)
    tr = _pick_row_tile(R, sub, max_rows)
    grid = (pl.cdiv(R, tr),)

    if input_buffers > 2:
        x_spec = pl.BlockSpec((tr, L), lambda i: (i, 0),
                              pipeline_mode=pl.Buffered(input_buffers))
    else:
        x_spec = pl.BlockSpec((tr, L), lambda i: (i, 0))

    out2 = pl.pallas_call(
        _pe_add_kernel,
        out_shape=jax.ShapeDtypeStruct((R, L), x.dtype),
        grid=grid,
        in_specs=[
            x_spec,
            pl.BlockSpec((1, L), lambda i: (0, 0)),
        ],
        out_specs=pl.BlockSpec((tr, L), lambda i: (i, 0)),
        # Aliasing only pays off if the caller donates x; otherwise XLA inserts
        # a defensive full copy that negates the win.
        input_output_aliases=({0: 0} if donate_x else {}),
        compiler_params=pltpu.CompilerParams(
            dimension_semantics=("parallel",),  # v7x: shard rows across both TCs
        ),
    )(x2, pe2)

    # TODO(synk): training-mode dropout not implemented; when added, fuse the
    # mask into _pe_add_kernel via pltpu.prng_seed/prng_random_bits rather than
    # a second HBM pass (this op is memory-bound). Eval-mode dropout = identity.
    return out2.reshape(B, S, D)


if __name__ == "__main__":
    d_model = 32
    max_len = 1000

    pe = build_pe_table(max_len, d_model)
    key = jax.random.PRNGKey(0)

    # Small case matching the module's natural shapes (B=2, S=8, D=32).
    # Force the Pallas path (default routing would use the XLA fast path here).
    B, S = 2, 8
    x = jax.random.normal(key, (B, S, d_model), dtype=jnp.float32)
    y = jax.block_until_ready(position_embedding_forward(x, pe, prefer_xla_below=0))
    y_ref = x + pe[:, S, :][:, None, :]
    assert y.shape == x.shape
    assert jnp.allclose(y, y_ref, atol=1e-6, rtol=1e-6)

    # Medium case forcing a multi-step pipelined grid (lane-dense path,
    # R = 512 rows x 128 lanes -> tr = 128, grid = (4,)).
    B2, S2 = 4, 512
    x2 = jax.random.normal(jax.random.PRNGKey(1), (B2, S2, d_model), dtype=jnp.float32)
    y2 = jax.block_until_ready(position_embedding_forward(x2, pe, prefer_xla_below=0))
    y2_ref = x2 + pe[:, S2, :][:, None, :]
    assert y2.shape == x2.shape
    assert jnp.allclose(y2, y2_ref, atol=1e-6, rtol=1e-6)

    # Default routing: tiny tensors take the plain-XLA fast path (no kernel
    # launch overhead); result must match bit-for-bit semantics.
    y3 = jax.block_until_ready(position_embedding_forward(x, pe))
    assert jnp.allclose(y3, y_ref, atol=1e-6, rtol=1e-6)

    print("KERNEL_OK")
</pallas_src>

<mosaic_0001>
module attributes {stable_mosaic.version = 11 : i64} {
  func.func @_pe_add_kernel(%arg0: i32, %arg1: memref<4x128xf32, #tpu.memory_space<vmem>>, %arg2: memref<1x128xf32, #tpu.memory_space<vmem>>, %arg3: memref<4x128xf32, #tpu.memory_space<vmem>>) attributes {dimension_semantics = [#tpu.dimension_semantics<parallel>], iteration_bounds = array<i64: 1>, scalar_prefetch = 0 : i64, scratch_operands = 0 : i64, tpu.core_type = #tpu.core_type<tc>, window_params = [{transform_indices = @transform_0, window_bounds = array<i64: 4, 128>}, {pipeline_mode = #tpu.pipeline_mode<synchronous>, transform_indices = @transform_1, window_bounds = array<i64: 1, 128>}, {transform_indices = @transform_2, window_bounds = array<i64: 4, 128>}]} {
    %c0 = arith.constant 0 : index
    %c0_0 = arith.constant 0 : index
    %0 = vector.load %arg1[%c0, %c0_0] : memref<4x128xf32, #tpu.memory_space<vmem>>, vector<4x128xf32>
    %c0_1 = arith.constant 0 : index
    %c0_2 = arith.constant 0 : index
    %1 = vector.load %arg2[%c0_1, %c0_2] : memref<1x128xf32, #tpu.memory_space<vmem>>, vector<1x128xf32>
    %2 = vector.broadcast %1 : vector<1x128xf32> to vector<4x128xf32>
    %3 = arith.addf %0, %2 : vector<4x128xf32>
    %c0_3 = arith.constant 0 : index
    %c0_4 = arith.constant 0 : index
    %4 = vector.load %arg3[%c0_3, %c0_4] : memref<4x128xf32, #tpu.memory_space<vmem>>, vector<4x128xf32>
    tpu.vector_store %arg3[%c0_3, %c0_4], %3 {strides = array<i32>} : memref<4x128xf32, #tpu.memory_space<vmem>>, vector<4x128xf32>,
    return
  }
  func.func @transform_0(%arg0: i32) -> (i32, i32) {
    %c0_i32 = arith.constant 0 : i32
    %c0_i32_0 = arith.constant 0 : i32
    return %arg0, %c0_i32 : i32, i32
  }
  func.func @transform_1(%arg0: i32) -> (i32, i32) {
    %c0_i32 = arith.constant 0 : i32
    %c0_i32_0 = arith.constant 0 : i32
    %c0_i32_1 = arith.constant 0 : i32
    return %c0_i32, %c0_i32_0 : i32, i32
  }
  func.func @transform_2(%arg0: i32) -> (i32, i32) {
    %c0_i32 = arith.constant 0 : i32
    %c0_i32_0 = arith.constant 0 : i32
    return %arg0, %c0_i32 : i32, i32
  }
}

</mosaic_0001>

<bundles_post_ra>
// kernel: tpu_custom_call.1
= control target key start
LH: loop header
LB: loop body
LE: loop exit
PB: predicated region body
PF: predicated region fallthrough
CT: control target
= control target key end

     0   :  { %7 = vsyncpa [#allocation3], 0  ;;  %s144_s0 = inlined_call_operand.hbm [shape: f32[4,128], index: 0, kind: input, shape index: {}]   ;;  %s145_s1 = inlined_call_operand.vmem [shape: f32[1,128], index: 1, kind: input, shape index: {}]   ;;  %s146_s2 = inlined_call_operand.hbm [shape: f32[4,128], index: 2, kind: output, shape index: {}]  }
   0x1   :  { %8 = vsyncpa [#allocation4], 0  ;;  %s100_s9 = smov [#allocation2]   ;;  %s52_s13 = scalar_lea.hbm %s144_s0, 64 }
   0x2   :  { %s15_s10 = sshll.u32 %s100_s9, 4  ;;  %p53_p0 = scmp.ne.s32.totalorder %s144_s0, %s52_s13  ;;  %s16_s10 = int_to_ptr.vmem [resolvable:$true] %s15_s10 }
   0x3   :  { %p56_p1 = scmp.lt.u32.totalorder %s52_s13, %s144_s0 }
   0x5   :  { %p58_p2 = pnand %p56_p1, %p53_p0 }
   0x7   :  { %61 = shalt.err (!%p58_p2)
}
   0x8   :  { %s62_s18 = scalar_lea.vmem %s16_s10, 64  ;;  %p67_p4 = scmp.lt.s32.totalorder %s16_s10, %s16_s10 }
   0x9   :  { %p63_p3 = scmp.ne.s32.totalorder %s16_s10, %s62_s18  ;;  %p68_p5 = scmp.lt.s32.totalorder %s62_s18, %s62_s18 }
   0xb   :  { %p69_p6 = por %p68_p5, %p67_p4 }
   0xd   :  { %p70_p7 = pnand %p69_p6, %p63_p3 }
   0xf   :  { %73 = shalt.err (!%p70_p7)
}
  0x10   :  { %18 = dma.hbm_to_vmem [thread:$0]  %s144_s0, 64, %s16_s10, [#allocation3]  }
  0x11   :  { %96 = dma.done.wait [#allocation3], 64  }
  0x12   :  { %97 = vsyncadd [#allocation3], 4294967232  ;;  %s101_s21 = smov [#allocation5]   ;;  %v24_v0 = vld [vmem:[#allocation2] sm:$0xf] }
  0x13   :  { %s40_s22 = sshll.u32 %s101_s21, 4  ;;  %v49_v1 = vld [vmem:[%s145_s1] ss:$0 sm:$0xff]  ;;  %s41_s22 = int_to_ptr.vmem [resolvable:$true] %s40_s22 }
  0x14   :  { %v32_v2 = vadd.f32 %v49_v1, %v24_v0  ;;  %s74_s25 = scalar_lea.vmem %s41_s22, 64  ;;  %p79_p9 = scmp.lt.s32.totalorder %s41_s22, %s41_s22 }
  0x15   :  { %p75_p8 = scmp.ne.s32.totalorder %s41_s22, %s74_s25  ;;  %p80_p10 = scmp.lt.s32.totalorder %s74_s25, %s74_s25 }
  0x16   :  { %33 = vst [vmem:[#allocation5] sm:$0xf] %v32_v2 }
  0x17   :  { %p81_p11 = por %p80_p10, %p79_p9 }
  0x19   :  { %p82_p12 = pnand %p81_p11, %p75_p8 }
  0x1b   :  { %85 = shalt.err (!%p82_p12)
}
  0x1c   :  { %s86_s27 = scalar_lea.hbm %s146_s2, 64 }
  0x1d   :  { %p87_p13 = scmp.ne.s32.totalorder %s146_s2, %s86_s27  ;;  %p90_p0 = scmp.lt.u32.totalorder %s86_s27, %s146_s2 }
  0x1f   :  { %p92_p1 = pnand %p90_p0, %p87_p13 }
  0x21   :  { %95 = shalt.err (!%p92_p1)
}
  0x22   :  { %43 = dma.vmem_to_hbm [thread:$0]  %s41_s22, 64, %s146_s2, [#allocation4]  }
  0x23   :  { %98 = dma.done.wait [#allocation4], 64  }
  0x24   :  { %99 = vsyncadd [#allocation4], 4294967232 }
  0x25   :  { %47 = vsyncpa [#allocation3], 1 }
  0x26   :  { %48 = vsyncpa [#allocation4], 1 }

</bundles_post_ra>
